<compile_context>
chip_gen: v7x
topology: tpu7x:2x2x1
jax: 0.10.0
libtpu: 0.0.40
codegen_flags: <defaults>
</compile_context>

<pallas_src>
import functools

import jax
import jax.numpy as jnp
from jax.experimental import pallas as pl
from jax.experimental.pallas import tpu as pltpu


def _make_kernel(pooling: str, n_timestamps: int):
    """Fused encoder (1x1 conv + ReLU) + temporal pooling kernel body."""
    T = n_timestamps

    def kernel(x_ref, w_ref, b_ref, o_ref):
        # x_ref : (C, T, TILE)   free NCHW reshape of x, HW lane-dense
        # w_ref : (OUT, C)       pointwise-conv weight (1/T folded in for 'mean')
        # b_ref : (OUT, 1)       bias (1/T folded in for 'mean')
        # o_ref : (OUT, TILE)    pooled output tile (native NCHW layout)
        w = w_ref[...]
        b = b_ref[...]
        acc = None
        for t in range(T):                       # static unroll: T small & known
            z = jnp.dot(w, x_ref[:, t, :], preferred_element_type=jnp.float32)
            if pooling == "max":
                # Pool pre-activations; bias+ReLU applied once afterwards.
                # Exact: bias is timestep-independent, max/ReLU are monotone.
                acc = z if t == 0 else jnp.maximum(acc, z)
            else:
                y = jnp.maximum(z + b, 0.0)
                if t == 0:
                    acc = y
                elif pooling == "diff":          # T == 2, enforced in wrapper
                    acc = acc - y
                else:                            # 'mean': 1/T pre-folded -> plain sum
                    acc = acc + y
        if pooling == "max":
            acc = jnp.maximum(acc + b, 0.0)
        o_ref[...] = acc.astype(o_ref.dtype)

    return kernel


def _vmem_budget_bytes():
    """Generation-aware VMEM budgets.

    Returns (tile_budget_bytes, vmem_limit_bytes).  tile_budget bounds the
    streamed (double-buffered) x/out tiles; vmem_limit is handed to the
    compiler so the default scoped limit (16 MiB on v5e, 32 MiB elsewhere)
    does not silently cap the pipeline.
      v7x  (64 MiB / TensorCore): ~32 MiB tile budget, 48 MiB scoped limit.
      v5e / v6e (128 MiB):        ~40 MiB tile budget, 96 MiB scoped limit.
    """
    cap = 64 * 1024 * 1024       # conservative default: v7x VMEM per TensorCore
    try:
        info = pltpu.get_tpu_info()
        cap = int(getattr(info, "vmem_capacity_bytes", cap) or cap)
    except Exception:            # no TPU info available -> keep the v7x-safe default
        pass
    tile_budget = min(cap // 2, 40 * 1024 * 1024)
    vmem_limit = min((cap * 3) // 4, 100 * 1024 * 1024)
    return tile_budget, vmem_limit


def _pick_hw_tile(hw: int, per_col_bytes: int, budget_bytes: int) -> int:
    """Largest lane-dense (multiple-of-128) HW tile under the VMEM budget.

    Uses cdiv tiling: the tile need not divide HW -- Pallas masks the partial
    last block -- so ragged / prime HW never degrades to a tiny tile or a
    single oversized block.
    """
    if hw <= 128:
        return hw                                     # one full (possibly ragged) block
    cap_cols = max(128, ((budget_bytes // max(per_col_bytes, 1)) // 128) * 128)
    full_cols = ((hw + 127) // 128) * 128             # one block can cover all of HW
    return min(cap_cols, full_cols)


def temporal_wrapper_forward(x, weight, bias, pooling="mean"):
    """Fused TemporalWrapper forward (encoder = 1x1 conv + ReLU).

    Args:
      x:      [B, C, T, H, W] (PyTorch NCHW + time layout), f32 or bf16.
      weight: [C, OUT] pointwise-conv weight of the synthetic encoder.
      bias:   [OUT] bias of the synthetic encoder.
      pooling: 'mean' | 'max' | 'diff'.

    Returns:
      list with one feature map of shape [B, OUT, H, W] (NCHW, dtype follows x),
      matching the PyTorch module's output (list of aggregated feature maps).
    """
    if x.ndim != 5:
        raise ValueError(f"Expected input shape [B, C, T, H, W], got {x.shape}")
    if pooling not in ("mean", "max", "diff"):
        raise ValueError("Pooling must be 'mean', 'max' or 'diff'")
    B, C, T, H, W = x.shape
    if pooling == "diff" and T != 2:
        raise ValueError("Expected 2 timestamps for aggregation method 'diff'")
    OUT = weight.shape[1]
    HW = H * W

    # ---- wrapper-side prep: metadata-only on x, tiny math on the weights ----
    x_flat = x.reshape(B, C, T, HW)              # free reshape (merges trailing H, W)

    w_oc = jnp.transpose(weight).astype(jnp.float32)   # (OUT, C)
    b_col = bias.astype(jnp.float32).reshape(OUT, 1)
    if pooling == "mean":
        # Fold 1/T into the affine map (exact via ReLU positive homogeneity),
        # so the kernel only needs a sum over timesteps.
        w_oc = w_oc / T
        b_col = b_col / T
    # bf16 at the boundary: matmul operands match x's dtype (all generations'
    # MXUs take bf16 natively); accumulation stays f32 via preferred_element_type.
    w_oc = w_oc.astype(x.dtype)

    out_dtype = x.dtype
    x_itemsize = jnp.dtype(x.dtype).itemsize
    o_itemsize = jnp.dtype(out_dtype).itemsize

    # Per-HW-column working set: double-buffered x / out tiles plus the f32
    # kernel-live values ((OUT, tile) accumulator + (OUT, tile) matmul result
    # + (C, tile) timestep slice), which are single-buffered and always f32.
    per_col_bytes = (2 * x_itemsize * C * T
                     + 2 * o_itemsize * OUT
                     + 4 * (2 * OUT + C))
    budget_bytes, vmem_limit_bytes = _vmem_budget_bytes()
    hw_tile = _pick_hw_tile(HW, per_col_bytes, budget_bytes)
    n_hw = pl.cdiv(HW, hw_tile)

    flops = 2 * B * HW * OUT * C * T
    bytes_accessed = (x_itemsize * B * C * T * HW
                      + o_itemsize * B * OUT * HW
                      + 4 * OUT * (C + 1))

    # TODO(synk): the weight/bias blocks have a constant index_map and could be
    # single-buffered (pipeline_mode=pl.Buffered(1)); left default-buffered
    # (< 1 KiB total) for maximum lowering portability.
    out = pl.pallas_call(
        _make_kernel(pooling, T),
        out_shape=jax.ShapeDtypeStruct((B, OUT, HW), out_dtype),
        grid=(B, n_hw),
        in_specs=[
            pl.BlockSpec((None, C, T, hw_tile), lambda bi, s: (bi, 0, 0, s)),
            pl.BlockSpec((OUT, C), lambda bi, s: (0, 0)),
            pl.BlockSpec((OUT, 1), lambda bi, s: (0, 0)),
        ],
        out_specs=pl.BlockSpec((None, OUT, hw_tile), lambda bi, s: (bi, 0, s)),
        compiler_params=pltpu.CompilerParams(
            dimension_semantics=("parallel", "parallel"),
            vmem_limit_bytes=vmem_limit_bytes),
        cost_estimate=pl.CostEstimate(
            flops=flops, transcendentals=0, bytes_accessed=bytes_accessed),
    )(x_flat, w_oc, b_col)

    # Pure reshape back to PyTorch NCHW feature-map layout [B, OUT, H, W].
    return [out.reshape(B, OUT, H, W)]


def _reference_forward(x, weight, bias, pooling="mean"):
    """Pure-JAX reference mirroring the PyTorch module semantics."""
    T = x.shape[2]
    feats = []
    for t in range(T):
        xt = x[:, :, t, :, :].astype(jnp.float32)                 # [B, C, H, W]
        y = jnp.einsum("bchw,co->bohw", xt, weight.astype(jnp.float32))
        y = y + bias.astype(jnp.float32)[None, :, None, None]
        feats.append(jnp.maximum(y, 0.0))
    stacked = jnp.stack(feats, axis=2)                            # [B, OUT, T, H, W]
    if pooling == "mean":
        return [jnp.mean(stacked, axis=2)]
    if pooling == "max":
        return [jnp.max(stacked, axis=2)]
    return [stacked[:, :, 0] - stacked[:, :, 1]]                  # diff (T == 2)


if __name__ == "__main__":
    # Small deterministic problem: B=2, C=4, T=3, H=W=16, encoder OUT=32.
    B, C, T, H, W, OUT = 2, 4, 3, 16, 16, 32

    key = jax.random.PRNGKey(0)
    kx, kw, kb, kx2 = jax.random.split(key, 4)
    x = jax.random.normal(kx, (B, C, T, H, W), dtype=jnp.float32)
    weight = 0.1 * jax.random.normal(kw, (C, OUT), dtype=jnp.float32)
    bias = 0.05 * jax.random.normal(kb, (OUT,), dtype=jnp.float32)

    for pooling in ("mean", "max"):
        fwd = jax.jit(functools.partial(temporal_wrapper_forward, pooling=pooling))
        out_list = fwd(x, weight, bias)
        jax.block_until_ready(out_list)
        ref_list = _reference_forward(x, weight, bias, pooling=pooling)
        assert out_list[0].shape == (B, OUT, H, W)
        assert jnp.allclose(out_list[0], ref_list[0], atol=1e-5, rtol=1e-5), pooling

    # 'diff' requires exactly 2 timestamps.
    x2 = jax.random.normal(kx2, (B, C, 2, H, W), dtype=jnp.float32)
    fwd = jax.jit(functools.partial(temporal_wrapper_forward, pooling="diff"))
    out_list = fwd(x2, weight, bias)
    jax.block_until_ready(out_list)
    ref_list = _reference_forward(x2, weight, bias, pooling="diff")
    assert out_list[0].shape == (B, OUT, H, W)
    assert jnp.allclose(out_list[0], ref_list[0], atol=1e-5, rtol=1e-5)

    # bf16 at the pallas_call boundary (HBM-bound kernel -> fewer bytes moved).
    x_bf16 = x.astype(jnp.bfloat16)
    fwd = jax.jit(functools.partial(temporal_wrapper_forward, pooling="mean"))
    out_bf = fwd(x_bf16, weight, bias)
    jax.block_until_ready(out_bf)
    assert out_bf[0].dtype == jnp.bfloat16
    ref_bf = _reference_forward(x_bf16.astype(jnp.float32), weight, bias, pooling="mean")
    assert jnp.allclose(out_bf[0].astype(jnp.float32), ref_bf[0], atol=5e-2, rtol=5e-2)

    print("KERNEL_OK")
</pallas_src>

<mosaic_0001>
module attributes {stable_mosaic.version = 11 : i64} {
  func.func @kernel(%arg0: i32, %arg1: i32, %arg2: memref<1x4x3x256xf32, #tpu.memory_space<vmem>>, %arg3: memref<32x4xf32, #tpu.memory_space<vmem>>, %arg4: memref<32x1xf32, #tpu.memory_space<vmem>>, %arg5: memref<1x32x256xf32, #tpu.memory_space<vmem>>) attributes {dimension_semantics = [#tpu.dimension_semantics<parallel>, #tpu.dimension_semantics<parallel>], iteration_bounds = array<i64: 2, 1>, scalar_prefetch = 0 : i64, scratch_operands = 0 : i64, tpu.core_type = #tpu.core_type<tc>, window_params = [{transform_indices = @transform_0, window_bounds = array<i64: 1, 4, 3, 256>}, {pipeline_mode = #tpu.pipeline_mode<synchronous>, transform_indices = @transform_1, window_bounds = array<i64: 32, 4>}, {pipeline_mode = #tpu.pipeline_mode<synchronous>, transform_indices = @transform_2, window_bounds = array<i64: 32, 1>}, {transform_indices = @transform_3, window_bounds = array<i64: 1, 32, 256>}]} {
    %c0 = arith.constant 0 : index
    %c0_0 = arith.constant 0 : index
    %0 = vector.load %arg3[%c0, %c0_0] : memref<32x4xf32, #tpu.memory_space<vmem>>, vector<32x4xf32>
    %c0_1 = arith.constant 0 : index
    %c0_2 = arith.constant 0 : index
    %1 = vector.load %arg4[%c0_1, %c0_2] : memref<32x1xf32, #tpu.memory_space<vmem>>, vector<32x1xf32>
    %c0_3 = arith.constant 0 : index
    %c0_4 = arith.constant 0 : index
    %c0_5 = arith.constant 0 : index
    %c0_6 = arith.constant 0 : index
    %2 = vector.load %arg2[%c0_3, %c0_4, %c0_5, %c0_6] : memref<1x4x3x256xf32, #tpu.memory_space<vmem>>, vector<1x4x1x256xf32>
    %3 = vector.shape_cast %2 : vector<1x4x1x256xf32> to vector<4x256xf32>
    %cst = arith.constant dense<0.000000e+00> : vector<32x256xf32>
    %4 = tpu.matmul %0, %3, %cst {dimension_numbers = #tpu.dot_dimension_numbers<[1], [0], [0], [1], [0, 0, 1, 1], [], []>} : vector<32x4xf32>, vector<4x256xf32>, vector<32x256xf32> -> vector<32x256xf32>
    %5 = vector.broadcast %1 : vector<32x1xf32> to vector<32x256xf32>
    %6 = arith.addf %4, %5 : vector<32x256xf32>
    %cst_7 = arith.constant 0.000000e+00 : f32
    %7 = vector.broadcast %cst_7 : f32 to vector<32x256xf32>
    %8 = arith.maximumf %6, %7 : vector<32x256xf32>
    %c0_8 = arith.constant 0 : index
    %c0_9 = arith.constant 0 : index
    %c1 = arith.constant 1 : index
    %c0_10 = arith.constant 0 : index
    %9 = vector.load %arg2[%c0_8, %c0_9, %c1, %c0_10] : memref<1x4x3x256xf32, #tpu.memory_space<vmem>>, vector<1x4x1x256xf32>
    %10 = vector.shape_cast %9 : vector<1x4x1x256xf32> to vector<4x256xf32>
    %cst_11 = arith.constant dense<0.000000e+00> : vector<32x256xf32>
    %11 = tpu.matmul %0, %10, %cst_11 {dimension_numbers = #tpu.dot_dimension_numbers<[1], [0], [0], [1], [0, 0, 1, 1], [], []>} : vector<32x4xf32>, vector<4x256xf32>, vector<32x256xf32> -> vector<32x256xf32>
    %12 = vector.broadcast %1 : vector<32x1xf32> to vector<32x256xf32>
    %13 = arith.addf %11, %12 : vector<32x256xf32>
    %cst_12 = arith.constant 0.000000e+00 : f32
    %14 = vector.broadcast %cst_12 : f32 to vector<32x256xf32>
    %15 = arith.maximumf %13, %14 : vector<32x256xf32>
    %16 = arith.addf %8, %15 : vector<32x256xf32>
    %c0_13 = arith.constant 0 : index
    %c0_14 = arith.constant 0 : index
    %c2 = arith.constant 2 : index
    %c0_15 = arith.constant 0 : index
    %17 = vector.load %arg2[%c0_13, %c0_14, %c2, %c0_15] : memref<1x4x3x256xf32, #tpu.memory_space<vmem>>, vector<1x4x1x256xf32>
    %18 = vector.shape_cast %17 : vector<1x4x1x256xf32> to vector<4x256xf32>
    %cst_16 = arith.constant dense<0.000000e+00> : vector<32x256xf32>
    %19 = tpu.matmul %0, %18, %cst_16 {dimension_numbers = #tpu.dot_dimension_numbers<[1], [0], [0], [1], [0, 0, 1, 1], [], []>} : vector<32x4xf32>, vector<4x256xf32>, vector<32x256xf32> -> vector<32x256xf32>
    %20 = vector.broadcast %1 : vector<32x1xf32> to vector<32x256xf32>
    %21 = arith.addf %19, %20 : vector<32x256xf32>
    %cst_17 = arith.constant 0.000000e+00 : f32
    %22 = vector.broadcast %cst_17 : f32 to vector<32x256xf32>
    %23 = arith.maximumf %21, %22 : vector<32x256xf32>
    %24 = arith.addf %16, %23 : vector<32x256xf32>
    %c0_18 = arith.constant 0 : index
    %c0_19 = arith.constant 0 : index
    %c0_20 = arith.constant 0 : index
    %25 = vector.load %arg5[%c0_18, %c0_19, %c0_20] : memref<1x32x256xf32, #tpu.memory_space<vmem>>, vector<1x32x256xf32>
    %26 = vector.shape_cast %25 : vector<1x32x256xf32> to vector<32x256xf32>
    %27 = vector.shape_cast %24 : vector<32x256xf32> to vector<1x32x256xf32>
    tpu.vector_store %arg5[%c0_18, %c0_19, %c0_20], %27 {strides = array<i32>} : memref<1x32x256xf32, #tpu.memory_space<vmem>>, vector<1x32x256xf32>,
    return
  }
  func.func @transform_0(%arg0: i32, %arg1: i32) -> (i32, i32, i32, i32) {
    %c0_i32 = arith.constant 0 : i32
    %c0_i32_0 = arith.constant 0 : i32
    %c0_i32_1 = arith.constant 0 : i32
    return %arg0, %c0_i32, %c0_i32_0, %arg1 : i32, i32, i32, i32
  }
  func.func @transform_1(%arg0: i32, %arg1: i32) -> (i32, i32) {
    %c0_i32 = arith.constant 0 : i32
    %c0_i32_0 = arith.constant 0 : i32
    %c0_i32_1 = arith.constant 0 : i32
    return %c0_i32, %c0_i32_0 : i32, i32
  }
  func.func @transform_2(%arg0: i32, %arg1: i32) -> (i32, i32) {
    %c0_i32 = arith.constant 0 : i32
    %c0_i32_0 = arith.constant 0 : i32
    %c0_i32_1 = arith.constant 0 : i32
    return %c0_i32, %c0_i32_0 : i32, i32
  }
  func.func @transform_3(%arg0: i32, %arg1: i32) -> (i32, i32, i32) {
    %c0_i32 = arith.constant 0 : i32
    %c0_i32_0 = arith.constant 0 : i32
    return %arg0, %c0_i32, %arg1 : i32, i32, i32
  }
}

</mosaic_0001>

<bundles_post_ra>
// kernel: temporal_wrapper_forward.1
= control target key start
LH: loop header
LB: loop body
LE: loop exit
PB: predicated region body
PF: predicated region fallthrough
CT: control target
= control target key end

     0   :  { %s917_s12 = smov 0   ;;  %s919_s13 = smov 0   ;;  %s1026_s0 = inlined_call_operand.vmem [shape: f32[2,4,3,256], index: 0, kind: input, shape index: {}]   ;;  %s1027_s1 = inlined_call_operand.vmem [shape: f32[32,4], index: 1, kind: input, shape index: {}]   ;;  %s1028_s2 = inlined_call_operand.vmem [shape: f32[32,1], index: 2, kind: input, shape index: {}]   ;;  %s1029_s3 = inlined_call_operand.vmem [shape: f32[2,32,256], index: 3, kind: output, shape index: {}]  }
   0x1   :  { %s921_s14 = smov 0  }
   0x2 LB: > { %s25_s15 = sadd.s32 1, %s888_s13  ;;  %p801_p0 = scmp.ge.s32.totalorder %s892_s14, 1  ;;  %s892_s14 = sphi %s921_s14, %s13_s14   ;;  %s888_s13 = sphi %s919_s13, %s1031_s13   ;;  %s884_s12 = sphi %s917_s12, %s1030_s12  }
   0x3   : > { %p27_p1 = scmp.ge.s32.totalorder %s25_s15, 2  ;;  %p158_p2 = scmp.lt.s32.totalorder %s892_s14, 3 }
   0x5   : > { %s1033_s15 = smov (%p27_p1, %s25_s15), 0  ;;  %p159_p3 = pnand %p801_p0, %p158_p2 }
   0x6   : > { %p191_p4 = scmp.lt.s32.totalorder (!%p159_p3), %s884_s12, 1  ;;  %v254_v0 = vlaneseq (!%p159_p3)  ;;  %v894_v1 = vmov (!%p159_p3), 1966171168   ;;  %v895_v3 = vmov (!%p159_p3), 0.0   ;;  %v896_v5 = vmov (!%p159_p3), 0   ;;  %v216_v6 = vld [vmem:[%s1028_s2 + $0x10] sm:$0xff] (!%p159_p3) }
   0x7   : > { %162 = sbr.rel (%p159_p3) target bundleno = 271 (0x10f), region = 32  ;;  %v252_v2 = vunpack.c.l.s4 (!%p159_p3), %v894_v1  ;;  %363 = vmatprep.mubr.f32.mxu0 (!%p159_p3), %v895_v3  ;;  %375 = vmatprep.mubr.f32.mxu1 (!%p159_p3), %v895_v3  ;;  %v214_v7 = vld [vmem:[%s1028_s2] sm:$0xff] (!%p159_p3)  ;;  %v217_v9 = vld [vmem:[%s1028_s2 + $0x18] sm:$0xff] (!%p159_p3)  ;;  %v215_v10 = vld [vmem:[%s1028_s2 + $0x8] sm:$0xff] (!%p159_p3)  ;;  %vm294_vm0 = vcmask (!%p159_p3), 1043456   ;;  %vm281_vm1 = vcmask (!%p159_p3), 31744  }
   0x8   : > { %v255_v4 = vshrl.u32 (!%p159_p3), %v254_v0, 7  ;;  %869 = vset.pattern.permute.xlu1 (!%p159_p3), %v896_v5  ;;  %868 = vset.pattern.permute.xlu0 (!%p159_p3), %v896_v5  ;;  %v210_v41 = vld [vmem:[%s1027_s1] sm:$0xff] (!%p159_p3)  ;;  %v212_v42 = vld [vmem:[%s1027_s1 + $0x10] sm:$0xff] (!%p159_p3)  ;;  %v213_v50 = vld [vmem:[%s1027_s1 + $0x18] sm:$0xff] (!%p159_p3) }
   0x9   : > { %v253_v8 = vunpack.c.0.s8 (!%p159_p3), %v252_v2  ;;  %237 = vperm.xlu1 (!%p159_p3), %869, %v216_v6   ;;  %227 = vperm.xlu0 (!%p159_p3), %868, %v214_v7   ;;  %v211_v51 = vld [vmem:[%s1027_s1 + $0x8] sm:$0xff] (!%p159_p3) }
   0xb   : > { %v256_v11 = vsub.s32 (!%p159_p3), %v253_v8, %v255_v4 }
   0xd   : > { %242 = vperm.xlu1 (!%p159_p3), %869, %v217_v9   ;;  %232 = vperm.xlu0 (!%p159_p3), %868, %v215_v10  }
   0xe   : > { %s1035_s12 = smov (!%p191_p4, %s884_s12), 1 }
   0xf   : > { %s837_s20 = sshll.u32 %s1035_s12, 5  ;;  %s838_s9 = sshll.u32 %s1035_s12, 6 }
  0x10   : > { %s198_s27 = scalar_lea.vmem %s1026_s0, %s837_s20  ;;  %s1005_s16 = scalar_lea.vmem %s1029_s3, %s838_s9 }
  0x11   : > { %v218_v12 = vld [vmem:[%s198_s27] ss:$4 sm:$0x3]  ;;  %v806_v13 = vld [vmem:[%s198_s27 + $0x8] ss:$4 sm:$0x3] }
  0x12   : > { %v807_v14 = vld [vmem:[%s198_s27 + $0x10] ss:$4 sm:$0x3]  ;;  %v808_v15 = vld [vmem:[%s198_s27 + $0x18] ss:$4 sm:$0x3]  ;;  %v249_v16 = vcombine.low %v218_v12, %v806_v13 }
  0x13   : > { %v250_v17 = vcombine.low %v807_v14, %v808_v15  ;;  %v815_v18 = vld [vmem:[%s198_s27 + $0x1] ss:$4 sm:$0x3]  ;;  %v816_v19 = vld [vmem:[%s198_s27 + $0x9] ss:$4 sm:$0x3] }
  0x14   : > { %v257_v20 = vrot.slane %v249_v16, %v256_v11  ;;  %v817_v21 = vld [vmem:[%s198_s27 + $0x11] ss:$4 sm:$0x3]  ;;  %v818_v22 = vld [vmem:[%s198_s27 + $0x19] ss:$4 sm:$0x3]  ;;  %v408_v23 = vcombine.low %v815_v18, %v816_v19 }
  0x15   : > { %v264_v24 = vrot.slane %v250_v17, %v256_v11  ;;  %v409_v25 = vcombine.low %v817_v21, %v818_v22  ;;  %v825_v26 = vld [vmem:[%s198_s27 + $0x2] ss:$4 sm:$0x3]  ;;  %v826_v27 = vld [vmem:[%s198_s27 + $0xa] ss:$4 sm:$0x3] }
  0x16   : > { %v416_v28 = vrot.slane %v408_v23, %v256_v11  ;;  %v827_v29 = vld [vmem:[%s198_s27 + $0x12] ss:$4 sm:$0x3]  ;;  %v828_v30 = vld [vmem:[%s198_s27 + $0x1a] ss:$4 sm:$0x3]  ;;  %v561_v31 = vcombine.low %v825_v26, %v826_v27 }
  0x17   : > { %v266_v32 = vcombine.high %v257_v20, %v264_v24  ;;  %v265_v33 = vcombine.low %v257_v20, %v264_v24  ;;  %v423_v34 = vrot.slane %v409_v25, %v256_v11  ;;  %v562_v35 = vcombine.low %v827_v29, %v828_v30 }
  0x18   : > { %v569_v36 = vrot.slane %v561_v31, %v256_v11 }
  0x19   : > { %v280_v37 = vrot.slane %v266_v32, %v256_v11  ;;  %v273_v38 = vrot.slane %v265_v33, %v256_v11  ;;  %v424_v39 = vcombine.low %v416_v28, %v423_v34  ;;  %v425_v40 = vcombine.high %v416_v28, %v423_v34 }
  0x1a   : > { %v576_v43 = vrot.slane %v562_v35, %v256_v11 }
  0x1b   : > { %809 = vmatprep.subr.msk.mxu0 %vm294_vm0, %v280_v37  ;;  %839 = vmatprep.subr.msk.mxu1 %vm294_vm0, %v280_v37  ;;  %v439_v44 = vrot.slane %v425_v40, %v256_v11  ;;  %v432_v45 = vrot.slane %v424_v39, %v256_v11 }
  0x1c   : > { %810 = vmatpush1.msk.msra.mxu0 %vm294_vm0, %v273_v38  ;;  %840 = vmatpush1.msk.msra.mxu1 %vm294_vm0, %v273_v38  ;;  %v577_v46 = vcombine.low %v569_v36, %v576_v43  ;;  %v578_v47 = vcombine.high %v569_v36, %v576_v43 }
  0x1d   : > { %811 = vmatmul.mubr.msk.f32.vlgmr.msra.gmra.mrb[0].mxu0 %vm281_vm1, %v210_v41  ;;  %813 = vmatmul.mubr.msk.f32.vlgmr.msra.gmra.mrb[0].mxu1 %vm281_vm1, %v212_v42 }
  0x1e   : > { %819 = vmatprep.subr.msk.mxu1 %vm294_vm0, %v439_v44  ;;  %v592_v48 = vrot.slane %v578_v47, %v256_v11  ;;  %369 = vmatprep.mubr.f32.mxu0 %v895_v3  ;;  %v585_v49 = vrot.slane %v577_v46, %v256_v11 }
  0x1f   : > { %820 = vmatpush1.msk.msra.mxu1 %vm294_vm0, %v432_v45  ;;  %381 = vmatprep.mubr.f32.mxu1 %v895_v3 }
  0x20   : > { %829 = vmatprep.subr.msk.mxu0 %vm294_vm0, %v592_v48 }
  0x21   : > { %830 = vmatpush1.msk.msra.mxu0 %vm294_vm0, %v585_v49  ;;  %814 = vmatmul.mubr.msk.f32.gmra.mrb[2].mxu1 %vm281_vm1, %v213_v50 }
  0x22   : > { %812 = vmatmul.mubr.msk.f32.gmra.mrb[2].mxu0 %vm281_vm1, %v211_v51  ;;  %508 = vmatprep.mubr.f32.mxu1 %v895_v3 }
  0x23   : > { %661 = vmatprep.mubr.f32.mxu0 %v895_v3 }
  0x25   : > { %821 = vmatmul.mubr.msk.f32.vlgmr.msra.gmra.mrb[4].mxu1 %vm281_vm1, %v210_v41 }
  0x26   : > { %831 = vmatmul.mubr.msk.f32.vlgmr.msra.gmra.mrb[4].mxu0 %vm281_vm1, %v210_v41  ;;  %514 = vmatprep.mubr.f32.mxu1 %v895_v3 }
  0x27   : > { %667 = vmatprep.mubr.f32.mxu0 %v895_v3 }
  0x29   : > { %822 = vmatmul.mubr.msk.f32.gmra.mrb[6].mxu1 %vm281_vm1, %v211_v51 }
  0x2a   : > { %832 = vmatmul.mubr.msk.f32.gmra.mrb[6].mxu0 %vm281_vm1, %v211_v51  ;;  %520 = vmatprep.mubr.f32.mxu1 %v895_v3 }
  0x2b   : > { %673 = vmatprep.mubr.f32.mxu0 %v895_v3 }
  0x2d   : > { %823 = vmatmul.mubr.msk.f32.gmra.mrb[8].mxu1 %vm281_vm1, %v212_v42 }
  0x2e   : > { %833 = vmatmul.mubr.msk.f32.gmra.mrb[8].mxu0 %vm281_vm1, %v212_v42  ;;  %526 = vmatprep.mubr.f32.mxu1 %v895_v3 }
  0x2f   : > { %679 = vmatprep.mubr.f32.mxu0 %v895_v3 }
  0x31   : > { %824 = vmatmul.mubr.msk.f32.gmra.mrb[10].mxu1 %vm281_vm1, %v213_v50 }
  0x32   : > { %834 = vmatmul.mubr.msk.f32.gmra.mrb[10].mxu0 %vm281_vm1, %v213_v50 }
  0x88   : > { %v228_v56 = vpop.permute.xlu0 %227  ;;  %v238_v4 = vpop.permute.xlu1 %237 }
  0x8c   : > { %v233_v63 = vpop.permute.xlu0 %232  ;;  %v243_v32 = vpop.permute.xlu1 %242 }
  0xf0   : > { %v377_v52 = vpop.f32.mrb[0].mxu1  ;;  %v365_v53 = vpop.f32.mrb[0].mxu0 }
  0xf1   : > { %v379_v54 = vpop.f32.mrb[1].mxu1  ;;  %v367_v55 = vpop.f32.mrb[1].mxu0  ;;  %v366_v61 = vadd.f32 %v365_v53, %v228_v56  ;;  %v378_v22 = vadd.f32 %v377_v52, %v238_v4 }
  0xf2   : > { %v368_v62 = vadd.f32 %v367_v55, %v228_v56  ;;  %v380_v23 = vadd.f32 %v379_v54, %v238_v4 }
  0xf3   : > { %v388_v8 = vmax.f32 %v366_v61, 0.0  ;;  %v392_v40 = vmax.f32 %v378_v22, 0.0 }
  0xf4   : > { %v997_v57 = vpop.f32.mrb[2].mxu1  ;;  %v389_v12 = vmax.f32 %v368_v62, 0.0  ;;  %v393_v44 = vmax.f32 %v380_v23, 0.0 }
  0xf5   : > { %v999_v58 = vpop.f32.mrb[3].mxu1  ;;  %v371_v59 = vpop.f32.mrb[2].mxu0  ;;  %v384_v52 = vadd.f32 %v997_v57, %v243_v32 }
  0xf6   : > { %v373_v60 = vpop.f32.mrb[3].mxu0  ;;  %v372_v11 = vadd.f32 %v371_v59, %v233_v63  ;;  %v386_v53 = vadd.f32 %v999_v58, %v243_v32 }
  0xf7   : > { %v374_v13 = vadd.f32 %v373_v60, %v233_v63  ;;  %v394_v58 = vmax.f32 %v384_v52, 0.0 }
  0xf8   : > { %v510_v0 = vpop.f32.mrb[4].mxu1  ;;  %v390_v29 = vmax.f32 %v372_v11, 0.0 }
  0xf9   : > { %v511_v1 = vadd.f32 %v510_v0, %v228_v56  ;;  %v512_v2 = vpop.f32.mrb[5].mxu1  ;;  %v663_v3 = vpop.f32.mrb[4].mxu0  ;;  %v391_v33 = vmax.f32 %v374_v13, 0.0 }
  0xfa   : > { %v513_v5 = vadd.f32 %v512_v2, %v228_v56  ;;  %v664_v6 = vadd.f32 %v663_v3, %v228_v56  ;;  %v665_v7 = vpop.f32.mrb[5].mxu0 }
  0xfb   : > { %v533_v9 = vmax.f32 %v511_v1, 0.0  ;;  %v666_v10 = vadd.f32 %v665_v7, %v228_v56  ;;  %v395_v7 = vmax.f32 %v386_v53, 0.0 }
  0xfc   : > { %v534_v14 = vmax.f32 %v513_v5, 0.0  ;;  %v686_v15 = vmax.f32 %v664_v6, 0.0  ;;  %v516_v16 = vpop.f32.mrb[6].mxu1 }
  0xfd   : > { %v541_v17 = vadd.f32 %v533_v9, %v388_v8  ;;  %v687_v18 = vmax.f32 %v666_v10, 0.0  ;;  %v517_v19 = vadd.f32 %v516_v16, %v233_v63  ;;  %v518_v20 = vpop.f32.mrb[7].mxu1  ;;  %v669_v21 = vpop.f32.mrb[6].mxu0 }
  0xfe   : > { %v542_v24 = vadd.f32 %v534_v14, %v389_v12  ;;  %v519_v25 = vadd.f32 %v518_v20, %v233_v63  ;;  %v670_v26 = vadd.f32 %v669_v21, %v233_v63  ;;  %v671_v27 = vpop.f32.mrb[7].mxu0 }
  0xff   : > { %v694_v28 = vadd.f32 %v686_v15, %v541_v17  ;;  %v535_v30 = vmax.f32 %v517_v19, 0.0  ;;  %v672_v31 = vadd.f32 %v671_v27, %v233_v63 }
 0x100   : > { %v695_v34 = vadd.f32 %v687_v18, %v542_v24  ;;  %v536_v35 = vmax.f32 %v519_v25, 0.0  ;;  %v688_v36 = vmax.f32 %v670_v26, 0.0  ;;  %v522_v37 = vpop.f32.mrb[8].mxu1 }
 0x101   : > { %702 = vst [vmem:[%s1005_s16] sm:$0xff] %v694_v28  ;;  %v543_v38 = vadd.f32 %v535_v30, %v390_v29  ;;  %v689_v39 = vmax.f32 %v672_v31, 0.0  ;;  %v523_v41 = vadd.f32 %v522_v37, %v238_v4  ;;  %v524_v42 = vpop.f32.mrb[9].mxu1  ;;  %v675_v43 = vpop.f32.mrb[8].mxu0 }
 0x102   : > { %703 = vst [vmem:[%s1005_s16 + $0x8] sm:$0xff] %v695_v34  ;;  %v544_v45 = vadd.f32 %v536_v35, %v391_v33  ;;  %v525_v46 = vadd.f32 %v524_v42, %v238_v4  ;;  %v676_v47 = vadd.f32 %v675_v43, %v238_v4  ;;  %v677_v48 = vpop.f32.mrb[9].mxu0 }
 0x103   : > { %v696_v49 = vadd.f32 %v688_v36, %v543_v38  ;;  %v537_v50 = vmax.f32 %v523_v41, 0.0  ;;  %v678_v51 = vadd.f32 %v677_v48, %v238_v4 }
 0x104   : > { %v697_v54 = vadd.f32 %v689_v39, %v544_v45  ;;  %v538_v55 = vmax.f32 %v525_v46, 0.0  ;;  %v690_v56 = vmax.f32 %v676_v47, 0.0  ;;  %v528_v59 = vpop.f32.mrb[10].mxu1 }
 0x105   : > { %704 = vst [vmem:[%s1005_s16 + $0x10] sm:$0xff] %v696_v49  ;;  %v545_v60 = vadd.f32 %v537_v50, %v392_v40  ;;  %v529_v61 = vadd.f32 %v528_v59, %v243_v32  ;;  %v681_v62 = vpop.f32.mrb[10].mxu0  ;;  %v530_v63 = vpop.f32.mrb[11].mxu1  ;;  %v691_v1 = vmax.f32 %v678_v51, 0.0 }
 0x106   : > { %705 = vst [vmem:[%s1005_s16 + $0x18] sm:$0xff] %v697_v54  ;;  %v546_v0 = vadd.f32 %v538_v55, %v393_v44  ;;  %v682_v2 = vadd.f32 %v681_v62, %v243_v32  ;;  %v531_v3 = vadd.f32 %v530_v63, %v243_v32  ;;  %v683_v4 = vpop.f32.mrb[11].mxu0 }
 0x107   : > { %v698_v57 = vadd.f32 %v690_v56, %v545_v60  ;;  %v539_v5 = vmax.f32 %v529_v61, 0.0  ;;  %v684_v6 = vadd.f32 %v683_v4, %v243_v32 }
 0x108   : > { %v699_v8 = vadd.f32 %v691_v1, %v546_v0  ;;  %v540_v9 = vmax.f32 %v531_v3, 0.0  ;;  %v692_v11 = vmax.f32 %v682_v2, 0.0 }
 0x109   : > { %706 = vst [vmem:[%s1005_s16 + $0x20] sm:$0xff] %v698_v57  ;;  %v547_v10 = vadd.f32 %v539_v5, %v394_v58  ;;  %v693_v13 = vmax.f32 %v684_v6, 0.0 }
 0x10a   : > { %707 = vst [vmem:[%s1005_s16 + $0x28] sm:$0xff] %v699_v8  ;;  %v548_v12 = vadd.f32 %v540_v9, %v395_v7 }
 0x10b   : > { %v700_v14 = vadd.f32 %v692_v11, %v547_v10 }
 0x10c   : > { %v701_v15 = vadd.f32 %v693_v13, %v548_v12 }
 0x10d   : > { %708 = vst [vmem:[%s1005_s16 + $0x30] sm:$0xff] %v700_v14 }
 0x10e   : > { %709 = vst [vmem:[%s1005_s16 + $0x38] sm:$0xff] %v701_v15 }
 0x10f PF: > { %s13_s14 = sadd.s32 1, %s892_s14   ;;  %s1030_s12 = smov %s888_s13 }
 0x110   : > { %p10_p5 = scmp.ge.s32.totalorder %s13_s14, 4   ;;  %s1031_s13 = smov %s1033_s15 }
 0x112   :  { %12 = sbr.rel (!%p10_p5) target bundleno = 2 (0x2), region = 73 }

</bundles_post_ra>
